<compile_context>
chip_gen: v7x
topology: tpu7x:2x2x1
jax: 0.10.0
libtpu: 0.0.40
codegen_flags: <defaults>
</compile_context>

<pallas_src>
import functools

import numpy as np

import jax
import jax.numpy as jnp
from jax.experimental import pallas as pl
from jax.experimental.pallas import tpu as pltpu


def _silu(x):
    return x * jax.nn.sigmoid(x)


def _se_bottleneck_kernel(H, W, fuse_im2col,
                          x_ref, mask_ref,
                          w1_ref, bn1s_ref, bn1b_ref,
                          wl1_ref, wl2_ref,
                          w2_ref, bn2s_ref, bn2b_ref,
                          o_ref, *scratch):
    """One batch element per grid step, channel-major (C, H*W) layout.

    x_ref   : (1, C1, HW)  input slab (NCHW flattened); lane axis = HW
    mask_ref: (9, HW)      precomputed 3x3 halo masks (compute dtype)
    w1_ref  : (CH, C1)     cv1 1x1 weight (Cout, Cin)     [f32 or bf16]
    bn1*    : (CH, 1)      folded BN1 scale / shift (f32)
    wl1_ref : (CR, CH)     SE fc1 (torch Linear layout, f32)
    wl2_ref : (CH, CR)     SE fc2 (f32)
    w2_ref  : (C2, 9*CH)   cv2 3x3 weight, columns ordered (ky, kx, cin)
    bn2*    : (C2, 1)      folded BN2 scale / shift (f32)
    o_ref   : (1, C2, HW)  output slab
    scratch : (9*CH, HW)   im2col slab VMEM scratch (only when fuse_im2col)
    """
    HW = H * W
    cdt = w1_ref.dtype                                   # matmul compute dtype
    CH = w1_ref.shape[0]

    x = x_ref[0].astype(cdt)                             # in-kernel cast, no wrapper HBM pass
    w1 = w1_ref[...]                                     # (CH, C1)

    # ---- cv1 #1: 1x1 conv as (CH,C1)@(C1,HW) + BN + SiLU --------------------
    h1 = jnp.dot(w1, x, preferred_element_type=jnp.float32)        # (CH, HW) f32
    h1 = h1 * bn1s_ref[...] + bn1b_ref[...]
    h1 = _silu(h1)

    # ---- squeeze-excite: lane-axis mean -> fc -> relu -> fc -> sigmoid ------
    pooled = jnp.mean(h1, axis=1, keepdims=True)                   # (CH, 1)
    z = jnp.maximum(jnp.dot(wl1_ref[...], pooled,
                            preferred_element_type=jnp.float32), 0.0)   # (CR, 1)
    s = jax.nn.sigmoid(jnp.dot(wl2_ref[...], z,
                               preferred_element_type=jnp.float32))     # (CH, 1)

    # ---- fold SE scale into cv1 weight:  w1 @ (h1*s) == (w1 @ diag(s)) @ h1 --
    # diag(s) via iota/where/lane-broadcast keeps the (CH,1) column on its
    # natural layout; the (CH,CH) matmul is tiny and lives on the MXU, not the
    # saturated VPU slot.
    ci = jax.lax.broadcasted_iota(jnp.int32, (CH, CH), 0)
    cj = jax.lax.broadcasted_iota(jnp.int32, (CH, CH), 1)
    diag_s = jnp.where(ci == cj, jnp.broadcast_to(s, (CH, CH)), 0.0)
    w1s = jnp.dot(w1.astype(jnp.float32), diag_s,
                  preferred_element_type=jnp.float32).astype(cdt)  # (CH, C1)

    # ---- cv1 applied a second time on SE-scaled activations -----------------
    h2 = jnp.dot(w1s, h1.astype(cdt), preferred_element_type=jnp.float32)
    h2 = h2 * bn1s_ref[...] + bn1b_ref[...]
    h2c = _silu(h2).astype(cdt)            # cast once: rolls / masks / slab stay in cdt

    # ---- cv2: 3x3 conv (pad=1) via lane rolls + resident halo masks ---------
    slab_ref = scratch[0] if fuse_im2col else None
    acc = None
    for t in range(9):
        ky, kx = t // 3 - 1, t % 3 - 1
        off = ky * W + kx
        # want tap[:, p] = h2c[:, p + off]  (jnp.roll semantics: shift = -off)
        tap = h2c if off == 0 else pltpu.roll(h2c, (-off) % HW, 1)
        if t != 4:                                       # center tap: no halo mask
            tap = tap * mask_ref[t:t + 1, :]             # precomputed, compute dtype
        if fuse_im2col:
            slab_ref[t * CH:(t + 1) * CH, :] = tap       # build (9*CH, HW) im2col slab
        else:
            part = jnp.dot(w2_ref[:, t * CH:(t + 1) * CH], tap,
                           preferred_element_type=jnp.float32)
            acc = part if acc is None else acc + part

    if fuse_im2col:
        acc = jnp.dot(w2_ref[...], slab_ref[...],
                      preferred_element_type=jnp.float32)           # (C2, HW) f32

    out = acc * bn2s_ref[...] + bn2b_ref[...]
    out = _silu(out)
    o_ref[0] = out.astype(o_ref.dtype)


def se_bottleneck(x_nchw, params, *, use_bf16=False, out_dtype=None, fuse_im2col=None):
    """NCHW wrapper.  Only a reshape NCHW -> (B, C, H*W) at the edges; any
    f32->bf16 cast of x happens inside the kernel (pass bf16 activations
    directly to also halve the x HBM stream)."""
    w1, bn1s, bn1b, l1, l2, w2, bn2s, bn2b = params
    B, C1, H, W = x_nchw.shape
    CH = w1.shape[0]
    CR = l1.shape[0]
    C2 = w2.shape[0]
    HW = H * W
    assert CH == C1 == w1.shape[1], "seBottleneck.forward only runs when int(c2*e) == c1"

    cdt = jnp.bfloat16 if use_bf16 else jnp.float32
    if out_dtype is None:
        out_dtype = cdt                 # bf16 writeback on the perf path
    if fuse_im2col is None:
        # Fused 9*CH im2col slab only while K=CH is below the MXU's native
        # contraction depth; above that, nine accumulating K=CH matmuls save
        # the 9x activation slab in VMEM (critical on v7x's 64 MiB).
        fuse_im2col = CH < 128

    x = x_nchw.reshape(B, C1, HW)       # reshape only, no dtype pass

    # Kernel-layout parameters (one-time, outside the kernel).
    w1k = w1.astype(cdt)                                            # (CH, C1)
    w2k = jnp.transpose(w2, (0, 2, 3, 1)).reshape(C2, 9 * CH).astype(cdt)  # cols (ky,kx,cin)
    bn1s_k = bn1s.reshape(CH, 1).astype(jnp.float32)
    bn1b_k = bn1b.reshape(CH, 1).astype(jnp.float32)
    bn2s_k = bn2s.reshape(C2, 1).astype(jnp.float32)
    bn2b_k = bn2b.reshape(C2, 1).astype(jnp.float32)
    wl1k = l1.astype(jnp.float32)                                   # (CR, CH)
    wl2k = l2.astype(jnp.float32)                                   # (CH, CR)

    # Precomputed 3x3 halo masks (compile-time constant), resident via a
    # constant index_map: removes per-step iota/compare/convert VPU work.
    pix = np.arange(HW)
    row, col = pix // W, pix % W
    mask_np = np.empty((9, HW), np.float32)
    for t in range(9):
        ky, kx = t // 3 - 1, t % 3 - 1
        m = np.ones((HW,), np.float32)
        if ky == -1:
            m *= (row >= 1)
        elif ky == 1:
            m *= (row <= H - 2)
        if kx == -1:
            m *= (col >= 1)
        elif kx == 1:
            m *= (col <= W - 2)
        mask_np[t] = m
    mask9 = jnp.asarray(mask_np, dtype=cdt)                         # (9, HW)

    kernel = functools.partial(_se_bottleneck_kernel, H, W, fuse_im2col)

    cdt_b = jnp.dtype(cdt).itemsize
    x_b = jnp.dtype(x_nchw.dtype).itemsize
    out_b = jnp.dtype(out_dtype).itemsize

    cost = pl.CostEstimate(
        flops=int(B * (2 * 2 * CH * C1 * HW + 4 * CH * CR + 2 * CH * CH * CH
                       + 2 * C2 * 9 * CH * HW)),
        transcendentals=int(B * (2 * CH * HW + C2 * HW + CH + CR)),
        bytes_accessed=int(B * C1 * HW * x_b + B * C2 * HW * out_b
                           + CH * C1 * cdt_b + C2 * 9 * CH * cdt_b + 9 * HW * cdt_b
                           + 2 * CR * CH * 4 + 2 * (CH + C2) * 4),
    )

    # Per-step VMEM footprint (double-buffered x/out blocks + resident weights
    # and masks + im2col scratch + f32 intermediates), with 2x headroom.
    # TODO(synk): at production sizes (C~256, HW~4k) add an H-strip grid axis
    # with a 1-row halo (and/or >1 batch element per step for tiny shapes) so
    # v7x's two TensorCores each get several steps to pipeline under 64 MiB.
    est = (2 * C1 * HW * x_b + 2 * C2 * HW * out_b
           + 2 * 9 * HW * cdt_b
           + 2 * (CH * C1 + C2 * 9 * CH + 2 * CR * CH + 2 * CH + 2 * C2) * cdt_b
           + (9 * CH * HW * cdt_b if fuse_im2col else 0)
           + 8 * CH * HW * 4 + 2 * C2 * HW * 4)
    vmem_limit = int(min(112 * 1024 * 1024, max(32 * 1024 * 1024, 2 * est)))

    grid_spec = pltpu.PrefetchScalarGridSpec(
        num_scalar_prefetch=0,
        grid=(B,),
        in_specs=[
            pl.BlockSpec((1, C1, HW), lambda b: (b, 0, 0)),
            pl.BlockSpec((9, HW), lambda b: (0, 0)),
            pl.BlockSpec((CH, C1), lambda b: (0, 0)),
            pl.BlockSpec((CH, 1), lambda b: (0, 0)),
            pl.BlockSpec((CH, 1), lambda b: (0, 0)),
            pl.BlockSpec((CR, CH), lambda b: (0, 0)),
            pl.BlockSpec((CH, CR), lambda b: (0, 0)),
            pl.BlockSpec((C2, 9 * CH), lambda b: (0, 0)),
            pl.BlockSpec((C2, 1), lambda b: (0, 0)),
            pl.BlockSpec((C2, 1), lambda b: (0, 0)),
        ],
        out_specs=pl.BlockSpec((1, C2, HW), lambda b: (b, 0, 0)),
        scratch_shapes=([pltpu.VMEM((9 * CH, HW), cdt)] if fuse_im2col else []),
    )

    out = pl.pallas_call(
        kernel,
        out_shape=jax.ShapeDtypeStruct((B, C2, HW), out_dtype),
        grid_spec=grid_spec,
        compiler_params=pltpu.CompilerParams(
            dimension_semantics=("parallel",),        # batch steps are independent
            vmem_limit_bytes=vmem_limit),
        cost_estimate=cost,
    )(x, mask9, w1k, bn1s_k, bn1b_k, wl1k, wl2k, w2k, bn2s_k, bn2b_k)

    return out.reshape(B, C2, H, W)


def init_params(key, c1, c2, e=0.5):
    """Deterministic synthetic parameters in PyTorch-native layouts."""
    c_ = int(c2 * e)
    assert c_ == c1, "seBottleneck.forward only runs when int(c2*e) == c1"
    cr = c1 // 4
    ks = jax.random.split(key, 12)

    def bn_fold(kg, kb, km, kv, c):
        gamma = 1.0 + 0.1 * jax.random.normal(kg, (c,))
        beta = 0.1 * jax.random.normal(kb, (c,))
        rmean = 0.1 * jax.random.normal(km, (c,))
        rvar = jax.random.uniform(kv, (c,), minval=0.5, maxval=1.5)
        scale = gamma / jnp.sqrt(rvar + 1e-5)
        shift = beta - rmean * scale
        return scale.astype(jnp.float32), shift.astype(jnp.float32)

    w1 = (0.2 * jax.random.normal(ks[0], (c_, c1))).astype(jnp.float32)        # cv1 1x1 (O, I)
    bn1s, bn1b = bn_fold(ks[1], ks[2], ks[3], ks[4], c_)
    l1 = (0.3 * jax.random.normal(ks[5], (cr, c1))).astype(jnp.float32)        # Linear(c1, c1//4)
    l2 = (0.3 * jax.random.normal(ks[6], (c1, cr))).astype(jnp.float32)        # Linear(c1//4, c1)
    w2 = (0.1 * jax.random.normal(ks[7], (c2, c_, 3, 3))).astype(jnp.float32)  # cv2 3x3 OIHW
    bn2s, bn2b = bn_fold(ks[8], ks[9], ks[10], ks[11], c2)
    return (w1, bn1s, bn1b, l1, l2, w2, bn2s, bn2b)


def reference_forward(x_nchw, params):
    """Pure-JAX NCHW reference of the same forward pass (for verification)."""
    w1, bn1s, bn1b, l1, l2, w2, bn2s, bn2b = params

    def conv_bn_silu(inp, w_oihw, scale, shift, pad):
        y = jax.lax.conv_general_dilated(
            inp, w_oihw, window_strides=(1, 1),
            padding=[(pad, pad), (pad, pad)],
            dimension_numbers=("NCHW", "OIHW", "NCHW"))
        y = y * scale[None, :, None, None] + shift[None, :, None, None]
        return y * jax.nn.sigmoid(y)

    h1 = conv_bn_silu(x_nchw, w1[:, :, None, None], bn1s, bn1b, 0)
    pooled = jnp.mean(h1, axis=(2, 3))                 # (B, CH)
    z = jnp.maximum(pooled @ l1.T, 0.0)
    s = jax.nn.sigmoid(z @ l2.T)
    xs = h1 * s[:, :, None, None]
    h2 = conv_bn_silu(xs, w1[:, :, None, None], bn1s, bn1b, 0)
    out = conv_bn_silu(h2, w2, bn2s, bn2b, 1)
    return out


if __name__ == "__main__":
    key = jax.random.PRNGKey(0)
    kx, kp = jax.random.split(key)

    B, C1, C2, H, W = 2, 8, 16, 16, 16        # c_ = int(C2*0.5) == C1, add=False
    x = jax.random.normal(kx, (B, C1, H, W), dtype=jnp.float32)
    params = init_params(kp, C1, C2)

    ref = reference_forward(x, params)

    # f32 path, fused im2col slab: tight check against the pure-JAX reference.
    out = jax.block_until_ready(se_bottleneck(x, params, use_bf16=False))
    assert out.shape == (B, C2, H, W), out.shape
    err = float(jnp.max(jnp.abs(out - ref)))
    assert jnp.allclose(out, ref, rtol=1e-3, atol=1e-3), f"f32 fused max_err={err}"

    # f32 path, per-tap accumulation branch (the CH >= 128 production path).
    out_pt = jax.block_until_ready(
        se_bottleneck(x, params, use_bf16=False, fuse_im2col=False))
    err_pt = float(jnp.max(jnp.abs(out_pt - ref)))
    assert jnp.allclose(out_pt, ref, rtol=1e-3, atol=1e-3), f"f32 per-tap max_err={err_pt}"

    # bf16 perf path (bf16 matmuls, slab and writeback): loose sanity check.
    out_bf16 = jax.block_until_ready(se_bottleneck(x, params, use_bf16=True))
    assert out_bf16.dtype == jnp.bfloat16
    out_bf16_f32 = out_bf16.astype(jnp.float32)
    err_bf = float(jnp.max(jnp.abs(out_bf16_f32 - ref)))
    assert jnp.allclose(out_bf16_f32, ref, rtol=1.5e-1, atol=2.5e-1), f"bf16 max_err={err_bf}"

    print("KERNEL_OK")
</pallas_src>

<mosaic_0001>
module attributes {stable_mosaic.version = 11 : i64} {
  func.func @_se_bottleneck_kernel(%arg0: i32, %arg1: memref<1x8x256xf32, #tpu.memory_space<vmem>>, %arg2: memref<9x256xf32, #tpu.memory_space<vmem>>, %arg3: memref<8x8xf32, #tpu.memory_space<vmem>>, %arg4: memref<8x1xf32, #tpu.memory_space<vmem>>, %arg5: memref<8x1xf32, #tpu.memory_space<vmem>>, %arg6: memref<2x8xf32, #tpu.memory_space<vmem>>, %arg7: memref<8x2xf32, #tpu.memory_space<vmem>>, %arg8: memref<16x72xf32, #tpu.memory_space<vmem>>, %arg9: memref<16x1xf32, #tpu.memory_space<vmem>>, %arg10: memref<16x1xf32, #tpu.memory_space<vmem>>, %arg11: memref<1x16x256xf32, #tpu.memory_space<vmem>>, %arg12: memref<72x256xf32, #tpu.memory_space<vmem>>) attributes {dimension_semantics = [#tpu.dimension_semantics<parallel>], iteration_bounds = array<i64: 2>, scalar_prefetch = 0 : i64, scratch_operands = 1 : i64, tpu.core_type = #tpu.core_type<tc>, window_params = [{transform_indices = @transform_0, window_bounds = array<i64: 1, 8, 256>}, {pipeline_mode = #tpu.pipeline_mode<synchronous>, transform_indices = @transform_1, window_bounds = array<i64: 9, 256>}, {pipeline_mode = #tpu.pipeline_mode<synchronous>, transform_indices = @transform_2, window_bounds = array<i64: 8, 8>}, {pipeline_mode = #tpu.pipeline_mode<synchronous>, transform_indices = @transform_3, window_bounds = array<i64: 8, 1>}, {pipeline_mode = #tpu.pipeline_mode<synchronous>, transform_indices = @transform_4, window_bounds = array<i64: 8, 1>}, {pipeline_mode = #tpu.pipeline_mode<synchronous>, transform_indices = @transform_5, window_bounds = array<i64: 2, 8>}, {pipeline_mode = #tpu.pipeline_mode<synchronous>, transform_indices = @transform_6, window_bounds = array<i64: 8, 2>}, {pipeline_mode = #tpu.pipeline_mode<synchronous>, transform_indices = @transform_7, window_bounds = array<i64: 16, 72>}, {pipeline_mode = #tpu.pipeline_mode<synchronous>, transform_indices = @transform_8, window_bounds = array<i64: 16, 1>}, {pipeline_mode = #tpu.pipeline_mode<synchronous>, transform_indices = @transform_9, window_bounds = array<i64: 16, 1>}, {transform_indices = @transform_10, window_bounds = array<i64: 1, 16, 256>}]} {
    %c0 = arith.constant 0 : index
    %c0_0 = arith.constant 0 : index
    %c0_1 = arith.constant 0 : index
    %0 = vector.load %arg1[%c0, %c0_0, %c0_1] : memref<1x8x256xf32, #tpu.memory_space<vmem>>, vector<1x8x256xf32>
    %1 = vector.shape_cast %0 : vector<1x8x256xf32> to vector<8x256xf32>
    %c0_2 = arith.constant 0 : index
    %c0_3 = arith.constant 0 : index
    %2 = vector.load %arg3[%c0_2, %c0_3] : memref<8x8xf32, #tpu.memory_space<vmem>>, vector<8x8xf32>
    %cst = arith.constant dense<0.000000e+00> : vector<8x256xf32>
    %3 = tpu.matmul %2, %1, %cst {dimension_numbers = #tpu.dot_dimension_numbers<[1], [0], [0], [1], [0, 0, 1, 1], [], []>} : vector<8x8xf32>, vector<8x256xf32>, vector<8x256xf32> -> vector<8x256xf32>
    %c0_4 = arith.constant 0 : index
    %c0_5 = arith.constant 0 : index
    %4 = vector.load %arg4[%c0_4, %c0_5] : memref<8x1xf32, #tpu.memory_space<vmem>>, vector<8x1xf32>
    %5 = vector.broadcast %4 : vector<8x1xf32> to vector<8x256xf32>
    %6 = arith.mulf %3, %5 : vector<8x256xf32>
    %c0_6 = arith.constant 0 : index
    %c0_7 = arith.constant 0 : index
    %7 = vector.load %arg5[%c0_6, %c0_7] : memref<8x1xf32, #tpu.memory_space<vmem>>, vector<8x1xf32>
    %8 = vector.broadcast %7 : vector<8x1xf32> to vector<8x256xf32>
    %9 = arith.addf %6, %8 : vector<8x256xf32>
    %10 = arith.negf %9 : vector<8x256xf32>
    %11 = math.exp %10 : vector<8x256xf32>
    %cst_8 = arith.constant 1.000000e+00 : f32
    %12 = vector.broadcast %cst_8 : f32 to vector<8x256xf32>
    %13 = arith.addf %12, %11 : vector<8x256xf32>
    %14 = arith.divf %12, %13 : vector<8x256xf32>
    %15 = arith.mulf %9, %14 : vector<8x256xf32>
    %cst_9 = arith.constant dense<0.000000e+00> : vector<8xf32>
    %16 = vector.multi_reduction <add>, %15, %cst_9 [1] : vector<8x256xf32> to vector<8xf32>
    %17 = vector.shape_cast %16 : vector<8xf32> to vector<8x1xf32>
    %cst_10 = arith.constant 2.560000e+02 : f32
    %18 = vector.broadcast %cst_10 : f32 to vector<8x1xf32>
    %19 = arith.divf %17, %18 : vector<8x1xf32>
    %c0_11 = arith.constant 0 : index
    %c0_12 = arith.constant 0 : index
    %20 = vector.load %arg6[%c0_11, %c0_12] : memref<2x8xf32, #tpu.memory_space<vmem>>, vector<2x8xf32>
    %cst_13 = arith.constant dense<0.000000e+00> : vector<2x1xf32>
    %21 = tpu.matmul %20, %19, %cst_13 {dimension_numbers = #tpu.dot_dimension_numbers<[1], [0], [0], [1], [0, 0, 1, 1], [], []>} : vector<2x8xf32>, vector<8x1xf32>, vector<2x1xf32> -> vector<2x1xf32>
    %cst_14 = arith.constant 0.000000e+00 : f32
    %22 = vector.broadcast %cst_14 : f32 to vector<2x1xf32>
    %23 = arith.maximumf %21, %22 : vector<2x1xf32>
    %c0_15 = arith.constant 0 : index
    %c0_16 = arith.constant 0 : index
    %24 = vector.load %arg7[%c0_15, %c0_16] : memref<8x2xf32, #tpu.memory_space<vmem>>, vector<8x2xf32>
    %cst_17 = arith.constant dense<0.000000e+00> : vector<8x1xf32>
    %25 = tpu.matmul %24, %23, %cst_17 {dimension_numbers = #tpu.dot_dimension_numbers<[1], [0], [0], [1], [0, 0, 1, 1], [], []>} : vector<8x2xf32>, vector<2x1xf32>, vector<8x1xf32> -> vector<8x1xf32>
    %26 = arith.negf %25 : vector<8x1xf32>
    %27 = math.exp %26 : vector<8x1xf32>
    %cst_18 = arith.constant 1.000000e+00 : f32
    %28 = vector.broadcast %cst_18 : f32 to vector<8x1xf32>
    %29 = arith.addf %28, %27 : vector<8x1xf32>
    %30 = arith.divf %28, %29 : vector<8x1xf32>
    %31 = tpu.iota {dimensions = array<i32: 0>} : vector<8x8xi32>
    %32 = tpu.iota {dimensions = array<i32: 1>} : vector<8x8xi32>
    %33 = arith.cmpi eq, %31, %32 : vector<8x8xi32>
    %34 = vector.shape_cast %30 : vector<8x1xf32> to vector<8x1xf32>
    %35 = vector.broadcast %34 : vector<8x1xf32> to vector<8x8xf32>
    %cst_19 = arith.constant 0.000000e+00 : f32
    %36 = vector.broadcast %cst_19 : f32 to vector<8x8xf32>
    %37 = arith.select %33, %35, %36 : vector<8x8xi1>, vector<8x8xf32>
    %cst_20 = arith.constant dense<0.000000e+00> : vector<8x8xf32>
    %38 = tpu.matmul %2, %37, %cst_20 {dimension_numbers = #tpu.dot_dimension_numbers<[1], [0], [0], [1], [0, 0, 1, 1], [], []>} : vector<8x8xf32>, vector<8x8xf32>, vector<8x8xf32> -> vector<8x8xf32>
    %cst_21 = arith.constant dense<0.000000e+00> : vector<8x256xf32>
    %39 = tpu.matmul %38, %15, %cst_21 {dimension_numbers = #tpu.dot_dimension_numbers<[1], [0], [0], [1], [0, 0, 1, 1], [], []>} : vector<8x8xf32>, vector<8x256xf32>, vector<8x256xf32> -> vector<8x256xf32>
    %c0_22 = arith.constant 0 : index
    %c0_23 = arith.constant 0 : index
    %40 = vector.load %arg4[%c0_22, %c0_23] : memref<8x1xf32, #tpu.memory_space<vmem>>, vector<8x1xf32>
    %41 = vector.broadcast %40 : vector<8x1xf32> to vector<8x256xf32>
    %42 = arith.mulf %39, %41 : vector<8x256xf32>
    %c0_24 = arith.constant 0 : index
    %c0_25 = arith.constant 0 : index
    %43 = vector.load %arg5[%c0_24, %c0_25] : memref<8x1xf32, #tpu.memory_space<vmem>>, vector<8x1xf32>
    %44 = vector.broadcast %43 : vector<8x1xf32> to vector<8x256xf32>
    %45 = arith.addf %42, %44 : vector<8x256xf32>
    %46 = arith.negf %45 : vector<8x256xf32>
    %47 = math.exp %46 : vector<8x256xf32>
    %cst_26 = arith.constant 1.000000e+00 : f32
    %48 = vector.broadcast %cst_26 : f32 to vector<8x256xf32>
    %49 = arith.addf %48, %47 : vector<8x256xf32>
    %50 = arith.divf %48, %49 : vector<8x256xf32>
    %51 = arith.mulf %45, %50 : vector<8x256xf32>
    %c17_i32 = arith.constant 17 : i32
    %52 = tpu.dynamic_rotate %51 by %c17_i32 dim 1 : vector<8x256xf32>, i32 -> vector<8x256xf32>
    %c0_27 = arith.constant 0 : index
    %c0_28 = arith.constant 0 : index
    %53 = vector.load %arg2[%c0_27, %c0_28] : memref<9x256xf32, #tpu.memory_space<vmem>>, vector<1x256xf32>
    %54 = vector.broadcast %53 : vector<1x256xf32> to vector<8x256xf32>
    %55 = arith.mulf %52, %54 : vector<8x256xf32>
    %c0_29 = arith.constant 0 : index
    %c0_30 = arith.constant 0 : index
    %56 = vector.load %arg12[%c0_29, %c0_30] : memref<72x256xf32, #tpu.memory_space<vmem>>, vector<8x256xf32>
    tpu.vector_store %arg12[%c0_29, %c0_30], %55 {strides = array<i32>} : memref<72x256xf32, #tpu.memory_space<vmem>>, vector<8x256xf32>,
    %c16_i32 = arith.constant 16 : i32
    %57 = tpu.dynamic_rotate %51 by %c16_i32 dim 1 : vector<8x256xf32>, i32 -> vector<8x256xf32>
    %c1 = arith.constant 1 : index
    %c0_31 = arith.constant 0 : index
    %58 = vector.load %arg2[%c1, %c0_31] : memref<9x256xf32, #tpu.memory_space<vmem>>, vector<1x256xf32>
    %59 = vector.broadcast %58 : vector<1x256xf32> to vector<8x256xf32>
    %60 = arith.mulf %57, %59 : vector<8x256xf32>
    %c8 = arith.constant 8 : index
    %c0_32 = arith.constant 0 : index
    %61 = vector.load %arg12[%c8, %c0_32] : memref<72x256xf32, #tpu.memory_space<vmem>>, vector<8x256xf32>
    tpu.vector_store %arg12[%c8, %c0_32], %60 {strides = array<i32>} : memref<72x256xf32, #tpu.memory_space<vmem>>, vector<8x256xf32>,
    %c15_i32 = arith.constant 15 : i32
    %62 = tpu.dynamic_rotate %51 by %c15_i32 dim 1 : vector<8x256xf32>, i32 -> vector<8x256xf32>
    %c2 = arith.constant 2 : index
    %c0_33 = arith.constant 0 : index
    %63 = vector.load %arg2[%c2, %c0_33] : memref<9x256xf32, #tpu.memory_space<vmem>>, vector<1x256xf32>
    %64 = vector.broadcast %63 : vector<1x256xf32> to vector<8x256xf32>
    %65 = arith.mulf %62, %64 : vector<8x256xf32>
    %c16 = arith.constant 16 : index
    %c0_34 = arith.constant 0 : index
    %66 = vector.load %arg12[%c16, %c0_34] : memref<72x256xf32, #tpu.memory_space<vmem>>, vector<8x256xf32>
    tpu.vector_store %arg12[%c16, %c0_34], %65 {strides = array<i32>} : memref<72x256xf32, #tpu.memory_space<vmem>>, vector<8x256xf32>,
    %c1_i32 = arith.constant 1 : i32
    %67 = tpu.dynamic_rotate %51 by %c1_i32 dim 1 : vector<8x256xf32>, i32 -> vector<8x256xf32>
    %c3 = arith.constant 3 : index
    %c0_35 = arith.constant 0 : index
    %68 = vector.load %arg2[%c3, %c0_35] : memref<9x256xf32, #tpu.memory_space<vmem>>, vector<1x256xf32>
    %69 = vector.broadcast %68 : vector<1x256xf32> to vector<8x256xf32>
    %70 = arith.mulf %67, %69 : vector<8x256xf32>
    %c24 = arith.constant 24 : index
    %c0_36 = arith.constant 0 : index
    %71 = vector.load %arg12[%c24, %c0_36] : memref<72x256xf32, #tpu.memory_space<vmem>>, vector<8x256xf32>
    tpu.vector_store %arg12[%c24, %c0_36], %70 {strides = array<i32>} : memref<72x256xf32, #tpu.memory_space<vmem>>, vector<8x256xf32>,
    %c32 = arith.constant 32 : index
    %c0_37 = arith.constant 0 : index
    %72 = vector.load %arg12[%c32, %c0_37] : memref<72x256xf32, #tpu.memory_space<vmem>>, vector<8x256xf32>
    tpu.vector_store %arg12[%c32, %c0_37], %51 {strides = array<i32>} : memref<72x256xf32, #tpu.memory_space<vmem>>, vector<8x256xf32>,
    %c255_i32 = arith.constant 255 : i32
    %73 = tpu.dynamic_rotate %51 by %c255_i32 dim 1 : vector<8x256xf32>, i32 -> vector<8x256xf32>
    %c5 = arith.constant 5 : index
    %c0_38 = arith.constant 0 : index
    %74 = vector.load %arg2[%c5, %c0_38] : memref<9x256xf32, #tpu.memory_space<vmem>>, vector<1x256xf32>
    %75 = vector.broadcast %74 : vector<1x256xf32> to vector<8x256xf32>
    %76 = arith.mulf %73, %75 : vector<8x256xf32>
    %c40 = arith.constant 40 : index
    %c0_39 = arith.constant 0 : index
    %77 = vector.load %arg12[%c40, %c0_39] : memref<72x256xf32, #tpu.memory_space<vmem>>, vector<8x256xf32>
    tpu.vector_store %arg12[%c40, %c0_39], %76 {strides = array<i32>} : memref<72x256xf32, #tpu.memory_space<vmem>>, vector<8x256xf32>,
    %c241_i32 = arith.constant 241 : i32
    %78 = tpu.dynamic_rotate %51 by %c241_i32 dim 1 : vector<8x256xf32>, i32 -> vector<8x256xf32>
    %c6 = arith.constant 6 : index
    %c0_40 = arith.constant 0 : index
    %79 = vector.load %arg2[%c6, %c0_40] : memref<9x256xf32, #tpu.memory_space<vmem>>, vector<1x256xf32>
    %80 = vector.broadcast %79 : vector<1x256xf32> to vector<8x256xf32>
    %81 = arith.mulf %78, %80 : vector<8x256xf32>
    %c48 = arith.constant 48 : index
    %c0_41 = arith.constant 0 : index
    %82 = vector.load %arg12[%c48, %c0_41] : memref<72x256xf32, #tpu.memory_space<vmem>>, vector<8x256xf32>
    tpu.vector_store %arg12[%c48, %c0_41], %81 {strides = array<i32>} : memref<72x256xf32, #tpu.memory_space<vmem>>, vector<8x256xf32>,
    %c240_i32 = arith.constant 240 : i32
    %83 = tpu.dynamic_rotate %51 by %c240_i32 dim 1 : vector<8x256xf32>, i32 -> vector<8x256xf32>
    %c7 = arith.constant 7 : index
    %c0_42 = arith.constant 0 : index
    %84 = vector.load %arg2[%c7, %c0_42] : memref<9x256xf32, #tpu.memory_space<vmem>>, vector<1x256xf32>
    %85 = vector.broadcast %84 : vector<1x256xf32> to vector<8x256xf32>
    %86 = arith.mulf %83, %85 : vector<8x256xf32>
    %c56 = arith.constant 56 : index
    %c0_43 = arith.constant 0 : index
    %87 = vector.load %arg12[%c56, %c0_43] : memref<72x256xf32, #tpu.memory_space<vmem>>, vector<8x256xf32>
    tpu.vector_store %arg12[%c56, %c0_43], %86 {strides = array<i32>} : memref<72x256xf32, #tpu.memory_space<vmem>>, vector<8x256xf32>,
    %c239_i32 = arith.constant 239 : i32
    %88 = tpu.dynamic_rotate %51 by %c239_i32 dim 1 : vector<8x256xf32>, i32 -> vector<8x256xf32>
    %c8_44 = arith.constant 8 : index
    %c0_45 = arith.constant 0 : index
    %89 = vector.load %arg2[%c8_44, %c0_45] : memref<9x256xf32, #tpu.memory_space<vmem>>, vector<1x256xf32>
    %90 = vector.broadcast %89 : vector<1x256xf32> to vector<8x256xf32>
    %91 = arith.mulf %88, %90 : vector<8x256xf32>
    %c64 = arith.constant 64 : index
    %c0_46 = arith.constant 0 : index
    %92 = vector.load %arg12[%c64, %c0_46] : memref<72x256xf32, #tpu.memory_space<vmem>>, vector<8x256xf32>
    tpu.vector_store %arg12[%c64, %c0_46], %91 {strides = array<i32>} : memref<72x256xf32, #tpu.memory_space<vmem>>, vector<8x256xf32>,
    %c0_47 = arith.constant 0 : index
    %c0_48 = arith.constant 0 : index
    %93 = vector.load %arg8[%c0_47, %c0_48] : memref<16x72xf32, #tpu.memory_space<vmem>>, vector<16x72xf32>
    %c0_49 = arith.constant 0 : index
    %c0_50 = arith.constant 0 : index
    %94 = vector.load %arg12[%c0_49, %c0_50] : memref<72x256xf32, #tpu.memory_space<vmem>>, vector<72x256xf32>
    %cst_51 = arith.constant dense<0.000000e+00> : vector<16x256xf32>
    %95 = tpu.matmul %93, %94, %cst_51 {dimension_numbers = #tpu.dot_dimension_numbers<[1], [0], [0], [1], [0, 0, 1, 1], [], []>} : vector<16x72xf32>, vector<72x256xf32>, vector<16x256xf32> -> vector<16x256xf32>
    %c0_52 = arith.constant 0 : index
    %c0_53 = arith.constant 0 : index
    %96 = vector.load %arg9[%c0_52, %c0_53] : memref<16x1xf32, #tpu.memory_space<vmem>>, vector<16x1xf32>
    %97 = vector.broadcast %96 : vector<16x1xf32> to vector<16x256xf32>
    %98 = arith.mulf %95, %97 : vector<16x256xf32>
    %c0_54 = arith.constant 0 : index
    %c0_55 = arith.constant 0 : index
    %99 = vector.load %arg10[%c0_54, %c0_55] : memref<16x1xf32, #tpu.memory_space<vmem>>, vector<16x1xf32>
    %100 = vector.broadcast %99 : vector<16x1xf32> to vector<16x256xf32>
    %101 = arith.addf %98, %100 : vector<16x256xf32>
    %102 = arith.negf %101 : vector<16x256xf32>
    %103 = math.exp %102 : vector<16x256xf32>
    %cst_56 = arith.constant 1.000000e+00 : f32
    %104 = vector.broadcast %cst_56 : f32 to vector<16x256xf32>
    %105 = arith.addf %104, %103 : vector<16x256xf32>
    %106 = arith.divf %104, %105 : vector<16x256xf32>
    %107 = arith.mulf %101, %106 : vector<16x256xf32>
    %c0_57 = arith.constant 0 : index
    %c0_58 = arith.constant 0 : index
    %c0_59 = arith.constant 0 : index
    %108 = vector.load %arg11[%c0_57, %c0_58, %c0_59] : memref<1x16x256xf32, #tpu.memory_space<vmem>>, vector<1x16x256xf32>
    %109 = vector.shape_cast %108 : vector<1x16x256xf32> to vector<16x256xf32>
    %110 = vector.shape_cast %107 : vector<16x256xf32> to vector<1x16x256xf32>
    tpu.vector_store %arg11[%c0_57, %c0_58, %c0_59], %110 {strides = array<i32>} : memref<1x16x256xf32, #tpu.memory_space<vmem>>, vector<1x16x256xf32>,
    return
  }
  func.func @transform_0(%arg0: i32) -> (i32, i32, i32) {
    %c0_i32 = arith.constant 0 : i32
    %c0_i32_0 = arith.constant 0 : i32
    %c0_i32_1 = arith.constant 0 : i32
    return %arg0, %c0_i32, %c0_i32_0 : i32, i32, i32
  }
  func.func @transform_1(%arg0: i32) -> (i32, i32) {
    %c0_i32 = arith.constant 0 : i32
    %c0_i32_0 = arith.constant 0 : i32
    %c0_i32_1 = arith.constant 0 : i32
    return %c0_i32, %c0_i32_0 : i32, i32
  }
  func.func @transform_2(%arg0: i32) -> (i32, i32) {
    %c0_i32 = arith.constant 0 : i32
    %c0_i32_0 = arith.constant 0 : i32
    %c0_i32_1 = arith.constant 0 : i32
    return %c0_i32, %c0_i32_0 : i32, i32
  }
  func.func @transform_3(%arg0: i32) -> (i32, i32) {
    %c0_i32 = arith.constant 0 : i32
    %c0_i32_0 = arith.constant 0 : i32
    %c0_i32_1 = arith.constant 0 : i32
    return %c0_i32, %c0_i32_0 : i32, i32
  }
  func.func @transform_4(%arg0: i32) -> (i32, i32) {
    %c0_i32 = arith.constant 0 : i32
    %c0_i32_0 = arith.constant 0 : i32
    %c0_i32_1 = arith.constant 0 : i32
    return %c0_i32, %c0_i32_0 : i32, i32
  }
  func.func @transform_5(%arg0: i32) -> (i32, i32) {
    %c0_i32 = arith.constant 0 : i32
    %c0_i32_0 = arith.constant 0 : i32
    %c0_i32_1 = arith.constant 0 : i32
    return %c0_i32, %c0_i32_0 : i32, i32
  }
  func.func @transform_6(%arg0: i32) -> (i32, i32) {
    %c0_i32 = arith.constant 0 : i32
    %c0_i32_0 = arith.constant 0 : i32
    %c0_i32_1 = arith.constant 0 : i32
    return %c0_i32, %c0_i32_0 : i32, i32
  }
  func.func @transform_7(%arg0: i32) -> (i32, i32) {
    %c0_i32 = arith.constant 0 : i32
    %c0_i32_0 = arith.constant 0 : i32
    %c0_i32_1 = arith.constant 0 : i32
    return %c0_i32, %c0_i32_0 : i32, i32
  }
  func.func @transform_8(%arg0: i32) -> (i32, i32) {
    %c0_i32 = arith.constant 0 : i32
    %c0_i32_0 = arith.constant 0 : i32
    %c0_i32_1 = arith.constant 0 : i32
    return %c0_i32, %c0_i32_0 : i32, i32
  }
  func.func @transform_9(%arg0: i32) -> (i32, i32) {
    %c0_i32 = arith.constant 0 : i32
    %c0_i32_0 = arith.constant 0 : i32
    %c0_i32_1 = arith.constant 0 : i32
    return %c0_i32, %c0_i32_0 : i32, i32
  }
  func.func @transform_10(%arg0: i32) -> (i32, i32, i32) {
    %c0_i32 = arith.constant 0 : i32
    %c0_i32_0 = arith.constant 0 : i32
    %c0_i32_1 = arith.constant 0 : i32
    return %arg0, %c0_i32, %c0_i32_0 : i32, i32, i32
  }
}

</mosaic_0001>

<bundles_post_ra>
// kernel: tpu_custom_call.1
= control target key start
LH: loop header
LB: loop body
LE: loop exit
PB: predicated region body
PF: predicated region fallthrough
CT: control target
= control target key end

     0   :  { %15 = vsyncpa [#allocation4], 0  ;;  %s1997_s0 = inlined_call_operand.vmem [shape: f32[2,8,256], index: 0, kind: input, shape index: {}]   ;;  %s1998_s1 = inlined_call_operand.vmem [shape: f32[9,256], index: 1, kind: input, shape index: {}]   ;;  %s1999_s2 = inlined_call_operand.hbm [shape: f32[8,8], index: 2, kind: input, shape index: {}]   ;;  %s2000_s3 = inlined_call_operand.vmem [shape: f32[8,1], index: 3, kind: input, shape index: {}]   ;;  %s2001_s4 = inlined_call_operand.vmem [shape: f32[8,1], index: 4, kind: input, shape index: {}]   ;;  %s2002_s5 = inlined_call_operand.hbm [shape: f32[2,8], index: 5, kind: input, shape index: {}]   ;;  %s2003_s6 = inlined_call_operand.vmem [shape: f32[8,2], index: 6, kind: input, shape index: {}]   ;;  %s2004_s7 = inlined_call_operand.vmem [shape: f32[16,72], index: 7, kind: input, shape index: {}]   ;;  %s2005_s8 = inlined_call_operand.vmem [shape: f32[16,1], index: 8, kind: input, shape index: {}]   ;;  %s2006_s9 = inlined_call_operand.vmem [shape: f32[16,1], index: 9, kind: input, shape index: {}]   ;;  %s2007_s10 = inlined_call_operand.hbm [shape: f32[2,16,256], index: 10, kind: output, shape index: {}]  }
   0x1   :  { %16 = vsyncpa [#allocation7], 0 }
   0x2   :  { %17 = vsyncpa [#allocation5], 0 }
   0x3   :  { %19 = vsyncpa [#allocation5 + $0x1], 0  ;;  %s1677_s13 = smov 0   ;;  %s1679_s14 = smov 0  }
   0x4   :  { %s1681_s15 = smov 0   ;;  %s1683_s16 = smov 0  }
   0x5 LB: > { %2012 = sst [smem:[#allocation12_spill]] %s1601_s15  ;;  %s1698_s17 = sadd.s32 4294967295, %s1605_s16   ;;  %s1605_s16 = sphi %s1683_s16, %s2029_s16   ;;  %s1601_s15 = sphi %s1681_s15, %s2026_s15   ;;  %s1597_s14 = sphi %s1679_s14, %s2028_s14   ;;  %s1593_s13 = sphi %s1677_s13, %s2027_s13  }
   0x6   : > { %s1289_s18 = sadd.s32 4294967294, %s1605_s16   ;;  %s1702_s19 = sadd.s32 1, %s1605_s16  }
   0x7   : > { %s247_s20 = sadd.s32 1, %s1601_s15  ;;  %s244_s21 = ssub.s32 %s1605_s16, %s1702_s19 }
   0x8   : > { %p257_p0 = scmp.ne.s32.totalorder %s1601_s15, %s1597_s14  ;;  %p245_p1 = scmp.eq.s32.totalorder %s244_s21, 0 }
   0x9   : > { %p258_p2 = scmp.eq.s32.totalorder %s1698_s17, 1  ;;  %p263_p3 = scmp.ne.s32.totalorder %s1597_s14, %s1593_s13 }
   0xa   : > { %p264_p4 = scmp.eq.s32.totalorder %s1289_s18, 1  ;;  %p1290_p7 = scmp.ge.s32.totalorder %s1605_s16, 1 }
   0xb   : > { %s1713_s22 = scalar_select %p245_p1, %s1601_s15, %s247_s20  }
   0xc   : > { %p1715_p5 = por %p258_p2, %p257_p0  ;;  %p1719_p6 = por %p264_p4, %p263_p3 }
   0xd   : > { %2013 = sst [smem:[#allocation13_spill]] %s1713_s22  ;;  %p271_p8 = scmp.lt.s32.totalorder %s1605_s16, 3 }
   0xe   : > { %s2014_s23 = scalar_select %p1715_p5, 1, 0 }
   0xf   : > { %s2015_s24 = scalar_select %p1719_p6, 1, 0 }
  0x10   : > { %p2008_p9 = scmp.eq.s32.totalorder %s1698_s17, 0  ;;  %p1726_p10 = pnand %p1290_p7, %p271_p8 }
  0x11   : > { %s1607_s26 = smov [#allocation3]   ;;  %s1608_s28 = smov [#allocation6]  }
  0x12   : > { %s2016_s25 = scalar_select %p1726_p10, 1, 0 }
  0x13   : > { %s287_s27 = sshll.u32 %s1607_s26, 4  ;;  %p1379_p11 = pneg %p1726_p10  ;;  %s288_s27 = int_to_ptr.vmem [resolvable:$true] %s287_s27 }
  0x14   : > { %s304_s29 = sshll.u32 %s1608_s28, 4  ;;  %s1479_s18 = scalar_lea.hbm %s1999_s2, 128  ;;  %s1738_s29 = int_to_ptr.vmem [resolvable:$true] %s304_s29 }
  0x15   : > { %p1734_p12 = pnand %p2008_p9, %p1379_p11  ;;  %p1480_p13 = scmp.ne.s32.totalorder %s1999_s2, %s1479_s18 }
  0x16   : > { %p1486_p3 = scmp.lt.u32.totalorder %s1479_s18, %s1999_s2 }
  0x17   : > { %p1481_p0 = pneg %p1734_p12 }
  0x19   : > { %p1482_p1 = pnand %p1481_p0, %p1480_p13 }
  0x1b   : > { %p1483_p2 = pneg %p1482_p1 }
  0x1d   : > { %p1488_p4 = pnand %p1486_p3, %p1483_p2 }
  0x1f   : > { %1491 = shalt.err (!%p1488_p4)
}
  0x20   : > { %s1492_s22 = scalar_lea.vmem %s288_s27, 128  ;;  %p1500_p9 = scmp.lt.s32.totalorder %s288_s27, %s288_s27 }
  0x21   : > { %p1493_p7 = scmp.ne.s32.totalorder %s288_s27, %s1492_s22  ;;  %p1501_p6 = scmp.lt.s32.totalorder %s1492_s22, %s1492_s22 }
  0x23   : > { %p1495_p8 = pnand %p1493_p7, %p1481_p0  ;;  %p1502_p5 = por %p1501_p6, %p1500_p9 }
  0x25   : > { %p1496_p11 = pneg %p1495_p8 }
  0x27   : > { %p1503_p10 = pnand %p1502_p5, %p1496_p11 }
  0x29   : > { %1506 = shalt.err (!%p1503_p10)
}
  0x2a   : > { %1382 = dma.hbm_to_vmem [thread:$0]  (!%p1734_p12), %s1999_s2, 128, %s288_s27, [#allocation4]  }
  0x2b   : > { %s1507_s21 = scalar_lea.hbm %s2002_s5, 32 }
  0x2c   : > { %p1508_p13 = scmp.ne.s32.totalorder %s2002_s5, %s1507_s21  ;;  %p1514_p9 = scmp.lt.u32.totalorder %s1507_s21, %s2002_s5 }
  0x2e   : > { %p1510_p6 = pnand %p1508_p13, %p1481_p0 }
  0x30   : > { %p1511_p5 = pneg %p1510_p6 }
  0x32   : > { %p1516_p10 = pnand %p1514_p9, %p1511_p5 }
  0x34   : > { %1519 = shalt.err (!%p1516_p10)
}
  0x35   : > { %s1520_s27 = scalar_lea.vmem %s1738_s29, 32  ;;  %p1528_p4 = scmp.lt.s32.totalorder %s1738_s29, %s1738_s29 }
  0x36   : > { %p1521_p1 = scmp.ne.s32.totalorder %s1738_s29, %s1520_s27  ;;  %p1529_p7 = scmp.lt.s32.totalorder %s1520_s27, %s1520_s27 }
  0x38   : > { %p1523_p2 = pnand %p1521_p1, %p1481_p0  ;;  %p1530_p8 = por %p1529_p7, %p1528_p4 }
  0x3a   : > { %p1524_p3 = pneg %p1523_p2 }
  0x3c   : > { %p1531_p11 = pnand %p1530_p8, %p1524_p3 }
  0x3e   : > { %1534 = shalt.err (!%p1531_p11)
}
  0x3f   : > { %1385 = dma.hbm_to_vmem [thread:$0]  (!%p1734_p12), %s2002_s5, 32, %s1738_s29, [#allocation7]  }
  0x40   : > { %p2018_p13 = scmp.ne.s32.totalorder %s2016_s25, 0 }
  0x41   : > { %p2019_p6 = scmp.eq.s32.totalorder (!%p2018_p13), %s1698_s17, 0 }
  0x42   : > { %337 = sbr.rel (%p2018_p13) target bundleno = 1939 (0x793), region = 60 }
  0x49   : > { %1580 = dma.done.wait (%p2019_p6), [#allocation4], 128   ;;  %p2020_p0 = pmov %p2019_p6 }
  0x4b   : > { %1582 = vsyncadd (%p2020_p0), [#allocation4], 4294967168  ;;  %p2021_p5 = pmov %p2020_p0 }
  0x4c   : > { %p2022_p9 = pmov %p2020_p0 }
  0x4d   : > { %1584 = dma.done.wait (%p2021_p5), [#allocation7], 32  }
  0x4e   : > { %1586 = vsyncadd (%p2022_p9), [#allocation7], 4294967264  ;;  %p379_p10 = scmp.lt.s32.totalorder %s1698_s17, 1  ;;  %v1609_v0 = vmov 0.0   ;;  %v1610_v1 = vmov 0   ;;  %v1804_v4 = vld [vmem:[#allocation3] sm:$0xff]  ;;  %v657_v39 = vlaneseq }
  0x4f   : > { %455 = vmatprep.mubr.f32.mxu0 %v1609_v0  ;;  %1441 = vset.pattern.permute.xlu0 %v1610_v1  ;;  %vm387_vm0 = vcmask 64512   ;;  %v462_v5 = vld [vmem:[%s2000_s3] sm:$0xff]  ;;  %vm1611_vm1 = vmmov 0   ;;  %v497_v28 = vld [vmem:[#allocation6] sm:$0x3]  ;;  %vm577_vm2 = vcmask 1041408  }
  0x50   : > { %s380_s25 = scalar_select %p379_p10, %s1698_s17, 1  ;;  %1442 = vset.pattern.permute.xlu1 %v1610_v1  ;;  %1114 = vmatprep.mubr.f32.mxu1 %v1609_v0  ;;  %v470_v6 = vld [vmem:[%s2001_s4] sm:$0xff]  ;;  %vm573_vm3 = vcmask 15360   ;;  %v1835_v40 = vshrl.u32 %v657_v39, 7  ;;  %v1837_v41 = vand.u32 127, %v657_v39  ;;  %v1128_v63 = vld [vmem:[%s2005_s8 + $0x8] sm:$0xff] }
  0x51   : > { %465 = vperm.xlu0 %1441, %v462_v5   ;;  %v572_v32 = vld [vmem:[%s2003_s6] sm:$0xff]  ;;  %s1612_s15 = smov 15   ;;  %s1613_s11 = smov 17   ;;  %v1144_v1 = vld [vmem:[%s2006_s9 + $0x8] sm:$0xff]  ;;  %vm1043_vm13 = vcmask 588800  }
  0x52   : > { %s1330_s29 = sshll.u32 %s380_s25, 4  ;;  %vm661_vm4 = vcmp.eq.s32.totalorder %v1835_v40, %v1837_v41  ;;  %s1614_s25 = smov 1   ;;  %v1127_v61 = vld [vmem:[%s2005_s8] sm:$0xff]  ;;  %v1887_v5 = vsub.s32 1, %v1835_v40  ;;  %vm834_vm5 = vcmp.lt.s32.totalorder %v1837_v41, 17  ;;  %vm857_vm6 = vcmp.lt.s32.totalorder %v1837_v41, 16 }
  0x53   : > { %s383_s18 = scalar_lea.vmem %s1997_s0, %s1330_s29  ;;  %s1615_s29 = smov 16   ;;  %v1143_v62 = vld [vmem:[%s2006_s9] sm:$0xff]  ;;  %vm881_vm7 = vcmp.lt.s32.totalorder %v1837_v41, 15  ;;  %vm905_vm8 = vcmp.lt.s32.totalorder %v1837_v41, 1  ;;  %vm931_vm9 = vcmp.lt.s32.totalorder %v1837_v41, 127  ;;  %vm955_vm10 = vcmp.lt.s32.totalorder %v1837_v41, 113 }
  0x54   : > { %v385_v2 = vld [vmem:[%s383_s18 + $0x8] sm:$0xff]  ;;  %v384_v3 = vld [vmem:[%s383_s18] sm:$0xff]  ;;  %s1616_s30 = smov 127   ;;  %s1617_s12 = smov 113   ;;  %vm979_vm11 = vcmp.lt.s32.totalorder %v1837_v41, 112  ;;  %vm1003_vm12 = vcmp.lt.s32.totalorder %v1837_v41, 111 }
  0x55   : > { %391 = vmatprep.subr.mxu0 %v385_v2  ;;  %473 = vperm.xlu0 %1441, %v470_v6   ;;  %s1618_s18 = smov 112   ;;  %s1619_s20 = smov 111   ;;  %v1023_v41 = vld [vmem:[%s2004_s7] sm:$0xff] }
  0x56   : > { %392 = vmatpush1.msra.mxu0 %v384_v3  ;;  %s376_s27 = sand.u32 1, %s1597_s14   ;;  %p2023_p1 = scmp.ne.s32.totalorder %s2014_s23, 0 }
  0x57   : > { %1300 = vmatmul.mubr.msk.f32.vlgmr.msra.gmra.mrb[0].mxu0 %vm387_vm0, %v1804_v4  ;;  %1338 = vmatprep.subr.mxu0 %v1609_v0  ;;  %s1955_s21 = scalar_lea.sflag [#allocation5], %s376_s27  ;;  %s1620_s26 = smov [#allocation8]  }
  0x58   : > { %1340 = vmatprep.mubr.msk.f32.mxu0 %vm1611_vm1, %v1609_v0  ;;  %s1539_s28 = sshll.u32 %s1620_s26, 4  ;;  %s1540_s28 = int_to_ptr.vmem [resolvable:$false] %s1539_s28 }
  0x59   : > { %s1541_s22 = scalar_lea.vmem %s1540_s28, 1024 }
  0xd0   : > { %v1815_v7 = vpop.permute.xlu0 %465 }
  0xd4   : > { %v1818_v11 = vpop.permute.xlu0 %473 }
 0x12a   : > { %v457_v8 = vpop.f32.mrb[0].mxu0 }
 0x12b   : > { %v468_v9 = vmul.f32 %v1815_v7, %v457_v8  ;;  %v459_v10 = vpop.f32.mrb[1].mxu0  ;;  %v1312_v8 = vld [vmem:[%s1998_s1 + $0x1] ss:$8 sm:$0x3] }
 0x12c   : > { %v469_v12 = vmul.f32 %v1815_v7, %v459_v10 }
 0x12d   : > { %v476_v13 = vadd.f32 %v1818_v11, %v468_v9 }
 0x12e   : > { %v477_v14 = vadd.f32 %v1818_v11, %v469_v12 }
 0x12f   : > { %v1301_v15 = vmul.f32 -1.442695, %v476_v13 }
 0x130   : > { %v1302_v16 = vmul.f32 -1.442695, %v477_v14 }
 0x131   : > { %1443 = vpow2.f32 %v1301_v15 }
 0x132   : > { %1445 = vpow2.f32 %v1302_v16 }
 0x13b   : > { %v1444_v17 = vpop.eup %1443 }
 0x13c   : > { %v1446_v18 = vpop.eup %1445  ;;  %v484_v19 = vadd.f32 1.0, %v1444_v17 }
 0x13d   : > { %v485_v20 = vadd.f32 1.0, %v1446_v18 }
 0x13e   : > { %1447 = vrcp.f32 %v484_v19 }
 0x13f   : > { %1449 = vrcp.f32 %v485_v20 }
 0x148   : > { %v1448_v21 = vpop.eup %1447 }
 0x149   : > { %v1450_v22 = vpop.eup %1449  ;;  %v490_v23 = vmul.f32 %v1448_v21, %v476_v13  ;;  %v870_v13 = vrot.slane %v1312_v8, %v1887_v5 }
 0x14a   : > { %v491_v24 = vmul.f32 %v1450_v22, %v477_v14  ;;  %v1313_v22 = vld [vmem:[%s1998_s1 + $0x2] ss:$8 sm:$0x3] }
 0x14c   : > { %v492_v25 = vadd.f32 %v491_v24, %v490_v23 }
 0x14e   : > { %493 = vadd.xlane.f32.xlu1 %v492_v25  ;;  %v1314_v25 = vld [vmem:[%s1998_s1 + $0x3] ss:$8 sm:$0x3] }
 0x1db   : > { %v494_v26 = vpop.xlane.xlu1 %493 }
 0x1dc   : > { %v496_v27 = vmul.f32 0.00390625, %v494_v26 }
 0x1de   : > { %1339 = vmatpush3.msra.mxu0 %v496_v27 }
 0x1df   : > { %1341 = vmatmul.mubr.msk.f32.vlgmr.msra.gmra.mrb[2].mxu0 %vm387_vm0, %v497_v28  ;;  %1343 = vmatprep.subr.mxu0 %v1609_v0 }
 0x1e0   : > { %1345 = vmatprep.mubr.msk.f32.mxu0 %vm1611_vm1, %v1609_v0 }
 0x2b2   : > { %v567_v29 = vpop.f32.mrb[2].mxu0 }
 0x2b3   : > { %v571_v30 = vmax.f32 %v567_v29, 0.0  ;;  %v1342_v31 = vpop.f32.mrb[3].mxu0 }
 0x2b4   : > { %v894_v31 = vrot.slane %v1313_v22, %v1887_v5 }
 0x2b5   : > { %1344 = vmatpush3.msk.msra.mxu0 %vm577_vm2, %v571_v30 }
 0x2b6   : > { %1346 = vmatmul.mubr.msk.f32.vlgmr.msra.gmra.mrb[4].mxu0 %vm573_vm3, %v572_v32  ;;  %1348 = vmatprep.subr.mxu0 %v1609_v0 }
 0x2b7   : > { %1350 = vmatprep.mubr.msk.f32.mxu0 %vm1611_vm1, %v1609_v0 }
 0x389   : > { %v647_v33 = vpop.f32.mrb[4].mxu0 }
 0x38a   : > { %v1306_v34 = vmul.f32 -1.442695, %v647_v33  ;;  %v1347_v35 = vpop.f32.mrb[5].mxu0  ;;  %v918_v33 = vrot.slane %v1314_v25, %v1887_v5 }
 0x38c   : > { %1451 = vpow2.f32 %v1306_v34  ;;  %v1315_v34 = vld [vmem:[%s1998_s1 + $0x5] ss:$8 sm:$0x3] }
 0x396   : > { %v1452_v36 = vpop.eup %1451 }
 0x397   : > { %v654_v37 = vadd.f32 1.0, %v1452_v36 }
 0x399   : > { %1453 = vrcp.f32 %v654_v37 }
 0x3a3   : > { %v1454_v38 = vpop.eup %1453 }
 0x3a4   : > { %664 = vperm.xlu1 %1442, %v1454_v38  }
 0x423   : > { %v665_v42 = vpop.permute.xlu1 %664 }
 0x424   : > { %1349 = vmatpush3.msk.msra.mxu0 %vm661_vm4, %v665_v42  ;;  %v944_v42 = vrot.slane %v1315_v34, %v1887_v5 }
 0x425   : > { %1351 = vmatmul.mubr.msk.f32.vlgmr.msra.gmra.mrb[6].mxu0 %vm387_vm0, %v1804_v4  ;;  %741 = vmatprep.subr.mxu0 %v491_v24  ;;  %v1884_v4 = vsub.s32 0, %v1835_v40 }
 0x426   : > { %742 = vmatpush1.msra.mxu0 %v490_v23  ;;  %805 = vmatprep.mubr.f32.mxu0 %v1609_v0 }
 0x427   : > { %v890_v29 = vrot.slane %v1313_v22, %v1884_v4  ;;  %v914_v32 = vrot.slane %v1314_v25, %v1884_v4  ;;  %v940_v40 = vrot.slane %v1315_v34, %v1884_v4 }
 0x4f8   : > { %v734_v43 = vpop.f32.mrb[6].mxu0 }
 0x4f9   : > { %1309 = vmatmul.mubr.msk.f32.vlgmr.msra.gmra.mrb[8].mxu0 %vm387_vm0, %v734_v43  ;;  %v1352_v44 = vpop.f32.mrb[7].mxu0 }
 0x5cc   : > { %v807_v45 = vpop.f32.mrb[8].mxu0 }
 0x5cd   : > { %v812_v46 = vmul.f32 %v807_v45, %v1815_v7  ;;  %v809_v47 = vpop.f32.mrb[9].mxu0 }
 0x5ce   : > { %v813_v48 = vmul.f32 %v809_v47, %v1815_v7  ;;  %v837_v7 = vld [vmem:[%s1998_s1] ss:$8 sm:$0x3] }
 0x5cf   : > { %v814_v49 = vadd.f32 %v812_v46, %v1818_v11  ;;  %v842_v10 = vrot.slane %v837_v7, %v1884_v4  ;;  %v846_v12 = vrot.slane %v837_v7, %v1887_v5 }
 0x5d0   : > { %v815_v50 = vadd.f32 %v813_v48, %v1818_v11  ;;  %v866_v11 = vrot.slane %v1312_v8, %v1884_v4 }
 0x5d1   : > { %v1310_v51 = vmul.f32 -1.442695, %v814_v49 }
 0x5d2   : > { %v1311_v52 = vmul.f32 -1.442695, %v815_v50 }
 0x5d3   : > { %1455 = vpow2.f32 %v1310_v51 }
 0x5d4   : > { %1457 = vpow2.f32 %v1311_v52 }
 0x5dd   : > { %v1456_v53 = vpop.eup %1455 }
 0x5de   : > { %v822_v54 = vadd.f32 1.0, %v1456_v53  ;;  %v1458_v55 = vpop.eup %1457 }
 0x5df   : > { %v823_v56 = vadd.f32 1.0, %v1458_v55  ;;  %v1316_v55 = vld [vmem:[%s1998_s1 + $0x6] ss:$8 sm:$0x3] }
 0x5e0   : > { %1459 = vrcp.f32 %v822_v54 }
 0x5e1   : > { %1461 = vrcp.f32 %v823_v56  ;;  %v1317_v56 = vld [vmem:[%s1998_s1 + $0x7] ss:$8 sm:$0x3] }
 0x5ea   : > { %v1460_v57 = vpop.eup %1459 }
 0x5eb   : > { %v1849_v58 = vmul.f32 %v1460_v57, %v814_v49  ;;  %v1462_v59 = vpop.eup %1461 }
 0x5ec   : > { %v1856_v60 = vmul.f32 %v1462_v59, %v815_v50 }
 0x5ed   : > { %877 = vrot.lane.b32.xlu1 %v1849_v58, %s1612_s15  ;;  %830 = vrot.lane.b32.xlu0 %v1849_v58, %s1613_s11 }
 0x5f1   : > { %901 = vrot.lane.b32.xlu1 %v1849_v58, %s1614_s25  ;;  %853 = vrot.lane.b32.xlu0 %v1849_v58, %s1615_s29 }
 0x5f5   : > { %927 = vrot.lane.b32.xlu1 %v1849_v58, %s1616_s30  ;;  %832 = vrot.lane.b32.xlu0 %v1856_v60, %s1613_s11 }
 0x5f9   : > { %951 = vrot.lane.b32.xlu1 %v1849_v58, %s1617_s12  ;;  %855 = vrot.lane.b32.xlu0 %v1856_v60, %s1615_s29 }
 0x5fd   : > { %975 = vrot.lane.b32.xlu1 %v1849_v58, %s1618_s18  ;;  %879 = vrot.lane.b32.xlu0 %v1856_v60, %s1612_s15  ;;  %s1297_s15 = sshll.u32 %s376_s27, 5 }
 0x5fe   : > { %s378_s11 = scalar_lea.vmem [#allocation8], %s1297_s15 }
 0x601   : > { %999 = vrot.lane.b32.xlu1 %v1849_v58, %s1619_s20  ;;  %903 = vrot.lane.b32.xlu0 %v1856_v60, %s1614_s25  ;;  %s1205_s25 = sshll.u32 %s378_s11, 4  ;;  %s1948_s25 = int_to_ptr.vmem [resolvable:$true] %s1205_s25 }
 0x602   : > { %p1542_p4 = scmp.lt.s32.totalorder %s1948_s25, %s1540_s28 }
 0x605   : > { %1131 = vperm.xlu1 %1442, %v1127_v61   ;;  %929 = vrot.lane.b32.xlu0 %v1856_v60, %s1616_s30  ;;  %s1331_s30 = sshll.u32 %s1698_s17, 9  ;;  %s1535_s17 = scalar_lea.vmem %s1948_s25, 512 }
 0x606   : > { %p1536_p12 = scmp.ne.s32.totalorder %s1948_s25, %s1535_s17  ;;  %p1543_p7 = scmp.lt.s32.totalorder %s1541_s22, %s1535_s17 }
 0x608   : > { %p1537_p2 = pnand %p1536_p12, %p2023_p1  ;;  %p1544_p8 = por %p1543_p7, %p1542_p4 }
 0x609   : > { %1147 = vperm.xlu1 %1442, %v1143_v62   ;;  %953 = vrot.lane.b32.xlu0 %v1856_v60, %s1617_s12  ;;  %v964_v62 = vrot.slane %v1316_v55, %v1884_v4 }
 0x60a   : > { %p1538_p3 = pneg %p1537_p2 }
 0x60c   : > { %p1545_p11 = pnand %p1544_p8, %p1538_p3 }
 0x60d   : > { %977 = vrot.lane.b32.xlu0 %v1856_v60, %s1618_s18 }
 0x611   : > { %1001 = vrot.lane.b32.xlu0 %v1856_v60, %s1619_s20  ;;  %s1953_s20 = scalar_lea.hbm %s2007_s10, %s1331_s30 }
 0x615   : > { %1136 = vperm.xlu0 %1441, %v1128_v63  }
 0x619   : > { %1152 = vperm.xlu0 %1441, %v1144_v1   ;;  %v968_v1 = vrot.slane %v1316_v55, %v1887_v5 }
 0x65f   : > { %v831_v2 = vpop.permute.xlu0 %830  ;;  %v878_v6 = vpop.permute.xlu1 %877 }
 0x663   : > { %v854_v3 = vpop.permute.xlu0 %853  ;;  %v902_v16 = vpop.permute.xlu1 %901 }
 0x667   : > { %v833_v9 = vpop.permute.xlu0 %832  ;;  %v928_v30 = vpop.permute.xlu1 %927 }
 0x668   : > { %v835_v14 = vsel %vm834_vm5, %v831_v2, %v833_v9  ;;  %v836_v15 = vsel %vm834_vm5, %v833_v9, %v831_v2  ;;  %v988_v2 = vrot.slane %v1317_v56, %v1884_v4 }
 0x669   : > { %v849_v20 = vmul.f32 %v842_v10, %v836_v15  ;;  %v850_v23 = vmul.f32 %v846_v12, %v835_v14 }
 0x66b   : > { %v856_v17 = vpop.permute.xlu0 %855  ;;  %v952_v47 = vpop.permute.xlu1 %951 }
 0x66c   : > { %v858_v18 = vsel %vm857_vm6, %v854_v3, %v856_v17  ;;  %v859_v19 = vsel %vm857_vm6, %v856_v17, %v854_v3  ;;  %v992_v3 = vrot.slane %v1317_v56, %v1887_v5 }
 0x66d   : > { %v873_v21 = vmul.f32 %v866_v11, %v859_v19  ;;  %v874_v24 = vmul.f32 %v870_v13, %v858_v18 }
 0x66f   : > { %v880_v26 = vpop.permute.xlu0 %879  ;;  %v1353_v27 = vpack.c.bf16 %v874_v24, %v850_v23  ;;  %v1355_v28 = vpack.c.bf16 %v873_v21, %v849_v20  ;;  %v976_v63 = vpop.permute.xlu1 %975 }
 0x670   : > { %v882_v35 = vsel %vm881_vm7, %v878_v6, %v880_v26  ;;  %v883_v36 = vsel %vm881_vm7, %v880_v26, %v878_v6  ;;  %v1318_v6 = vld [vmem:[%s1998_s1 + $0x10] ss:$8 sm:$0x3] }
 0x671   : > { %1354 = vmatprep.subr.bf16.mxu1 %v1353_v27  ;;  %v897_v43 = vmul.f32 %v890_v29, %v883_v36  ;;  %v898_v44 = vmul.f32 %v894_v31, %v882_v35  ;;  %v1016_v10 = vrot.slane %v1318_v6, %v1887_v5  ;;  %v1012_v19 = vrot.slane %v1318_v6, %v1884_v4  ;;  %v1024_v4 = vld [vmem:[%s2004_s7 + $0x8] sm:$0xff] }
 0x672   : > { %1356 = vmatpush1.bf16.msra.mxu1 %v1355_v28 }
 0x673   : > { %v904_v37 = vpop.permute.xlu0 %903  ;;  %v1000_v15 = vpop.permute.xlu1 %999 }
 0x674   : > { %v906_v38 = vsel %vm905_vm8, %v902_v16, %v904_v37  ;;  %v907_v39 = vsel %vm905_vm8, %v904_v37, %v902_v16 }
 0x675   : > { %v921_v45 = vmul.f32 %v914_v32, %v907_v39  ;;  %v922_v46 = vmul.f32 %v918_v33, %v906_v38 }
 0x677   : > { %v930_v48 = vpop.permute.xlu0 %929  ;;  %v1357_v49 = vpack.c.bf16 %v922_v46, %v898_v44  ;;  %v1359_v50 = vpack.c.bf16 %v921_v45, %v897_v43 }
 0x678   : > { %v932_v51 = vsel %vm931_vm9, %v928_v30, %v930_v48  ;;  %v933_v52 = vsel %vm931_vm9, %v930_v48, %v928_v30 }
 0x679   : > { %v947_v53 = vmul.f32 %v940_v40, %v932_v51  ;;  %v948_v54 = vmul.f32 %v944_v42, %v933_v52  ;;  %1358 = vmatprep.subr.bf16.mxu1 %v1357_v49 }
 0x67a   : > { %1360 = vmatpush1.bf16.msra.mxu1 %v1359_v50 }
 0x67b   : > { %v954_v57 = vpop.permute.xlu0 %953  ;;  %v1361_v59 = vpack.c.bf16 %v948_v54, %v1856_v60  ;;  %v1363_v61 = vpack.c.bf16 %v947_v53, %v1849_v58 }
 0x67c   : > { %v956_v7 = vsel %vm955_vm10, %v952_v47, %v954_v57  ;;  %v957_v60 = vsel %vm955_vm10, %v954_v57, %v952_v47 }
 0x67d   : > { %1362 = vmatprep.subr.bf16.mxu1 %v1361_v59  ;;  %v971_v11 = vmul.f32 %v964_v62, %v956_v7  ;;  %v972_v12 = vmul.f32 %v968_v1, %v957_v60 }
 0x67e   : > { %1364 = vmatpush1.bf16.msra.mxu1 %v1363_v61 }
 0x67f   : > { %v978_v58 = vpop.permute.xlu0 %977 }
 0x680   : > { %v980_v8 = vsel %vm979_vm11, %v976_v63, %v978_v58  ;;  %v981_v9 = vsel %vm979_vm11, %v978_v58, %v976_v63 }
 0x681   : > { %v995_v13 = vmul.f32 %v988_v2, %v980_v8  ;;  %v996_v14 = vmul.f32 %v992_v3, %v981_v9 }
 0x683   : > { %v1002_v16 = vpop.permute.xlu0 %1001  ;;  %v1365_v17 = vpack.c.bf16 %v996_v14, %v972_v12  ;;  %v1367_v18 = vpack.c.bf16 %v995_v13, %v971_v11 }
 0x684   : > { %v1005_v20 = vsel %vm1003_vm12, %v1002_v16, %v1000_v15  ;;  %v1004_v21 = vsel %vm1003_vm12, %v1000_v15, %v1002_v16  ;;  %v1132_v5 = vpop.permute.xlu1 %1131 }
 0x685   : > { %v1020_v22 = vmul.f32 %v1016_v10, %v1005_v20  ;;  %1366 = vmatprep.subr.bf16.mxu1 %v1365_v17  ;;  %v1019_v23 = vmul.f32 %v1012_v19, %v1004_v21 }
 0x686   : > { %1368 = vmatpush1.bf16.msra.mxu1 %v1367_v18 }
 0x687   : > { %1066 = vmatprep.subr.mxu1 %v1020_v22 }
 0x688   : > { %v1148_v28 = vpop.permute.xlu1 %1147 }
 0x68a   : > { %1067 = vmatpush1.msra.mxu1 %v1019_v23 }
 0x68b   : > { %1319 = vmatmul.mubr.msk.f32.vlgmr.msra.gmra.mrb[0].mxu1 %vm1043_vm13, %v1023_v41 }
 0x68c   : > { %1120 = vmatprep.mubr.f32.mxu1 %v1609_v0 }
 0x68f   : > { %1320 = vmatmul.mubr.msk.f32.gmra.mrb[2].mxu1 %vm1043_vm13, %v1024_v4 }
 0x694   : > { %v1137_v24 = vpop.permute.xlu0 %1136 }
 0x698   : > { %v1153_v36 = vpop.permute.xlu0 %1152 }
 0x75e   : > { %v1116_v25 = vpop.f32.mrb[0].mxu1 }
 0x75f   : > { %v1139_v26 = vmul.f32 %v1132_v5, %v1116_v25  ;;  %v1118_v27 = vpop.f32.mrb[1].mxu1 }
 0x760   : > { %v1140_v29 = vmul.f32 %v1132_v5, %v1118_v27 }
 0x761   : > { %v1155_v30 = vadd.f32 %v1148_v28, %v1139_v26 }
 0x762   : > { %v1156_v31 = vadd.f32 %v1148_v28, %v1140_v29  ;;  %v1122_v32 = vpop.f32.mrb[2].mxu1 }
 0x763   : > { %v1321_v33 = vmul.f32 -1.442695, %v1155_v30  ;;  %v1141_v34 = vmul.f32 %v1137_v24, %v1122_v32  ;;  %v1124_v35 = vpop.f32.mrb[3].mxu1 }
 0x764   : > { %v1322_v0 = vmul.f32 -1.442695, %v1156_v31  ;;  %v1142_v37 = vmul.f32 %v1137_v24, %v1124_v35 }
 0x765   : > { %1463 = vpow2.f32 %v1321_v33  ;;  %v1157_v38 = vadd.f32 %v1153_v36, %v1141_v34 }
 0x766   : > { %1465 = vpow2.f32 %v1322_v0  ;;  %v1158_v39 = vadd.f32 %v1153_v36, %v1142_v37 }
 0x767   : > { %v1323_v40 = vmul.f32 -1.442695, %v1157_v38 }
 0x768   : > { %v1324_v42 = vmul.f32 -1.442695, %v1158_v39 }
 0x769   : > { %1467 = vpow2.f32 %v1323_v40 }
 0x76a   : > { %1469 = vpow2.f32 %v1324_v42 }
 0x76f   : > { %v1464_v43 = vpop.eup %1463 }
 0x770   : > { %v1466_v44 = vpop.eup %1465  ;;  %v1171_v45 = vadd.f32 1.0, %v1464_v43 }
 0x771   : > { %v1172_v46 = vadd.f32 1.0, %v1466_v44 }
 0x772   : > { %1471 = vrcp.f32 %v1171_v45 }
 0x773   : > { %v1468_v47 = vpop.eup %1467  ;;  %1473 = vrcp.f32 %v1172_v46 }
 0x774   : > { %v1470_v48 = vpop.eup %1469  ;;  %v1173_v49 = vadd.f32 1.0, %v1468_v47 }
 0x775   : > { %v1174_v50 = vadd.f32 1.0, %v1470_v48 }
 0x776   : > { %1475 = vrcp.f32 %v1173_v49 }
 0x777   : > { %1477 = vrcp.f32 %v1174_v50 }
 0x77c   : > { %v1472_v51 = vpop.eup %1471 }
 0x77d   : > { %v1474_v52 = vpop.eup %1473  ;;  %v1183_v53 = vmul.f32 %v1472_v51, %v1155_v30 }
 0x77e   : > { %v1184_v54 = vmul.f32 %v1474_v52, %v1156_v31 }
 0x77f   : > { %1187 = vst [vmem:[%s378_s11] sm:$0xff] %v1183_v53 }
 0x780   : > { %v1476_v55 = vpop.eup %1475  ;;  %1188 = vst [vmem:[%s378_s11 + $0x8] sm:$0xff] %v1184_v54 }
 0x781   : > { %v1478_v56 = vpop.eup %1477  ;;  %v1185_v57 = vmul.f32 %v1476_v55, %v1157_v38 }
 0x782   : > { %v1186_v59 = vmul.f32 %v1478_v56, %v1158_v39 }
 0x783   : > { %1189 = vst [vmem:[%s378_s11 + $0x10] sm:$0xff] %v1185_v57 }
 0x784   : > { %1190 = vst [vmem:[%s378_s11 + $0x18] sm:$0xff] %v1186_v59 }
 0x785   : > { %1548 = shalt.err (!%p1545_p11)
}
 0x786   : > { %s1549_s27 = scalar_lea.hbm %s1953_s20, 512  ;;  %s1553_s30 = scalar_lea.hbm %s2007_s10, 1024 }
 0x787   : > { %p1550_p13 = scmp.ne.s32.totalorder %s1953_s20, %s1549_s27  ;;  %p1554_p5 = scmp.lt.u32.totalorder %s1953_s20, %s2007_s10 }
 0x788   : > { %p1555_p9 = scmp.lt.u32.totalorder %s1553_s30, %s1549_s27  ;;  %p1557_p12 = scmp.lt.u32.totalorder %s1549_s27, %s1953_s20 }
 0x789   : > { %p1551_p6 = pnand %p1550_p13, %p2023_p1 }
 0x78a   : > { %p1556_p10 = por %p1555_p9, %p1554_p5 }
 0x78b   : > { %p1552_p0 = pneg %p1551_p6 }
 0x78c   : > { %p1558_p2 = por %p1557_p12, %p1556_p10 }
 0x78e   : > { %p1559_p3 = pnand %p1558_p2, %p1552_p0 }
 0x790   : > { %1562 = shalt.err (!%p1559_p3)
}
 0x791   : > { %s1621_s17 = smov 256  }
 0x792   : > { %1377 = dma.vmem_to_hbm [thread:$0]  (%p2023_p1), %s1948_s25, 512, %s1953_s20, %s1955_s21, %s1621_s17, %s1621_s17, %s1615_s29  }
 0x793 PF: > { %p1394_p4 = scmp.ge.s32.totalorder %s1605_s16, 2  ;;  %s1220_s26 = sand.u32 1, %s1593_s13  }
 0x794   : > { %p2024_p7 = scmp.ne.s32.totalorder %s2015_s24, 0  ;;  %s1221_s28 = scalar_lea.sflag [#allocation5], %s1220_s26 }
 0x796   : > { %p1387_p8 = pnand %p1394_p4, %p2024_p7 }
 0x798   : > { %1588 = dma.done.wait (!%p1387_p8), %s1221_s28, 512  }
 0x799   : > { %1590 = vsyncadd (!%p1387_p8), %s1221_s28, 4294966784  ;;  %s2025_s22 = sld [smem:[#allocation12_spill]]  ;;  %s2026_s15 = sld [smem:[#allocation13_spill]] }
 0x79a   : > { %p22_p11 = scmp.ge.s32.totalorder %s1702_s19, 4   ;;  %s2027_s13 = smov %s1597_s14 }
 0x79b   : > { %s2029_s16 = smov %s1702_s19 }
 0x79c   :  { %24 = sbr.rel (!%p22_p11) target bundleno = 5 (0x5), region = 111 }
 0x79f   : > { %s2028_s14 = smov %s2025_s22 }
 0x7a3   :  { %1226 = vsyncpa [#allocation4], 1 }
 0x7a4   :  { %1228 = vsyncpa [#allocation4 + $0x1], 1 }
 0x7a5   :  { %1229 = vsyncpa [#allocation7], 1 }
 0x7a6   :  { %1230 = vsyncpa [#allocation5], 1 }
 0x7a7   :  { %1232 = vsyncpa [#allocation5 + $0x1], 1 }

</bundles_post_ra>
